<compile_context>
chip_gen: v6e
topology: v6e:2x2x1
jax: 0.10.0
libtpu: 0.0.40
codegen_flags: <defaults>
</compile_context>

<pallas_src>
import functools

import jax
import jax.numpy as jnp
from jax.experimental import pallas as pl
from jax.experimental.pallas import tpu as pltpu


def prepare_graph_trojan_params(W, b):
    """One-time weight prep (hoisted out of the per-call forward path).

    Returns (Wt, b_row): W pre-transposed so the kernel contracts with a plain
    ((1,),(0,)) dot, and the bias as a (1, S) lane row.
    """
    Wt = jnp.asarray(W, jnp.float32).T
    b_row = jnp.asarray(b, jnp.float32).reshape(1, -1)
    return Wt, b_row


def _gtn_kernel(x_ref, wt_ref, b_ref, mask_ref, out_ref, *, thrd, bt, s):
    # x_ref/mask_ref/out_ref: (bt, s, s); wt_ref: (s, s) pre-transposed W;
    # b_ref: (1, s).  thrd/bt/s are static Python values closed over.

    # Single MXU matmul for all bt graphs in this grid step (M = bt*s).
    # Collapsing (bt, s, s) -> (bt*s, s) keeps the minor (sublane, lane) layout
    # (s is a multiple of 8), so the reshape is layout-preserving.
    x2 = x_ref[...].reshape(bt * s, s)
    y = jnp.dot(x2, wt_ref[...], preferred_element_type=jnp.float32)
    y = jnp.maximum(y + b_ref[...], 0.0)          # bias (+) relu

    # Per-graph symmetrization + fused threshold*mask:
    #   where(y > thrd, 1, 0) * mask == where(y > thrd, mask, 0)
    # Static unroll keeps only ~3 (s, s) tiles live at a time.
    for g in range(bt):
        yg = y[g * s:(g + 1) * s, :]
        yg = (yg + yg.T) * 0.5
        out_ref[g] = jnp.where(yg > thrd, mask_ref[g], 0.0).astype(out_ref.dtype)


def _choose_tiling(B, graphs_per_step):
    """Pick graphs-per-step Bt and the grid length.

    Keeps the grid length >= 2 whenever B >= 2 so multi-TensorCore chips (v7x)
    can shard the batch axis; a no-op on single-TC v5e/v6e.
    """
    Bt = max(1, min(graphs_per_step, B))
    if B > 1:
        Bt = min(Bt, -(-B // 2))       # Bt <= ceil(B/2)  => >= 2 grid steps
    num_steps = -(-B // Bt)            # cdiv
    return Bt, num_steps


def _compiler_params(bt, s):
    # Double-buffered x/mask/out tiles + resident Wt/bias + in-body temporaries.
    tile = 4 * bt * s * s
    est = 6 * tile + 2 * 4 * s * s + 3 * tile
    vmem_limit = None
    if est > 16 * 2**20:               # only override when the default scoped
        vmem_limit = min(int(est * 3 // 2), 120 * 2**20)   # limit is actually at risk
    return pltpu.CompilerParams(
        dimension_semantics=("parallel",),
        vmem_limit_bytes=vmem_limit,
    )


def graph_trojan_net_forward_batched(x, mask, Wt, b_row, thrd, *,
                                     graphs_per_step=8):
    """Batched forward.

    x, mask: (B, S, S) sharing the prepared weights (Wt, b_row) and the static
    Python-float threshold `thrd`.
    """
    B, S, S2 = x.shape
    assert S == S2, "for_whom='topo' requires square (S, S) graphs"
    assert Wt.shape == (S, S) and b_row.shape == (1, S)

    Bt, num_steps = _choose_tiling(B, graphs_per_step)
    Bp = Bt * num_steps

    xf = jnp.asarray(x, jnp.float32)
    mf = jnp.asarray(mask, jnp.float32)
    if Bp != B:
        # Rare fallback (B not divisible by Bt). Padded graphs have zero mask,
        # so their outputs are zero and are sliced off below.
        pad = ((0, Bp - B), (0, 0), (0, 0))
        xf = jnp.pad(xf, pad)
        mf = jnp.pad(mf, pad)

    kernel = functools.partial(_gtn_kernel, thrd=float(thrd), bt=Bt, s=S)
    tile_spec = pl.BlockSpec((Bt, S, S), lambda i: (i, 0, 0))

    out = pl.pallas_call(
        kernel,
        out_shape=jax.ShapeDtypeStruct((Bp, S, S), jnp.float32),
        grid=(num_steps,),
        in_specs=[
            tile_spec,                                  # x tiles
            pl.BlockSpec((S, S), lambda i: (0, 0)),     # Wt (resident across grid)
            pl.BlockSpec((1, S), lambda i: (0, 0)),     # bias row (resident)
            tile_spec,                                  # mask tiles
        ],
        out_specs=tile_spec,
        compiler_params=_compiler_params(Bt, S),
    )(xf, Wt, b_row, mf)
    return out if Bp == B else out[:B]


def graph_trojan_net_forward(x, mask, Wt, b_row, thrd):
    """Single-graph forward: x, mask are (S, S)."""
    return graph_trojan_net_forward_batched(x[None], mask[None], Wt, b_row, thrd)[0]


def _reference(x, W, b, mask, thrd):
    y = x @ W.T + b
    y = jnp.maximum(y, 0.0)
    y = (y + jnp.swapaxes(y, -1, -2)) * 0.5
    y = jnp.where(y > thrd, 1.0, 0.0)
    return y * mask


if __name__ == "__main__":
    S = 32   # sq_dim (graph size); 'topo' mode requires a square (S, S) input
    B = 8    # batch of graphs -> grid=(2,) with 4 graphs per step
    key = jax.random.PRNGKey(0)
    kx, kw, kb, km = jax.random.split(key, 4)

    # adjacency-like inputs and deterministic "trained" parameters
    x = jax.random.uniform(kx, (B, S, S), dtype=jnp.float32)
    W = jax.random.normal(kw, (S, S), dtype=jnp.float32) * (1.0 / jnp.sqrt(S))
    b = jax.random.normal(kb, (S,), dtype=jnp.float32) * 0.1
    mask = (jax.random.uniform(km, (B, S, S)) > 0.5).astype(jnp.float32)
    thrd = 0.5

    # TODO(synk): nn.Dropout(p=0.05) is identity at inference; training-mode
    # stochastic dropout is intentionally not modeled here.

    # One-time weight prep (hoisted out of the forward path).
    Wt, b_row = prepare_graph_trojan_params(W, b)

    # Batched path (folds 4 graphs per grid step into one MXU matmul).
    out = jax.block_until_ready(
        graph_trojan_net_forward_batched(x, mask, Wt, b_row, thrd))
    ref = _reference(x, W, b, mask, thrd)
    assert out.shape == (B, S, S)
    assert jnp.allclose(out, ref, atol=1e-5), "batched mismatch vs reference"

    # Single-graph path.
    out1 = jax.block_until_ready(
        graph_trojan_net_forward(x[0], mask[0], Wt, b_row, thrd))
    assert out1.shape == (S, S)
    assert jnp.allclose(out1, ref[0], atol=1e-5), "single-graph mismatch vs reference"

    print("KERNEL_OK")
</pallas_src>

<mosaic_0001>
module attributes {stable_mosaic.version = 11 : i64} {
  func.func @_gtn_kernel(%arg0: i32, %arg1: memref<4x32x32xf32, #tpu.memory_space<vmem>>, %arg2: memref<32x32xf32, #tpu.memory_space<vmem>>, %arg3: memref<1x32xf32, #tpu.memory_space<vmem>>, %arg4: memref<4x32x32xf32, #tpu.memory_space<vmem>>, %arg5: memref<4x32x32xf32, #tpu.memory_space<vmem>>) attributes {dimension_semantics = [#tpu.dimension_semantics<parallel>], iteration_bounds = array<i64: 2>, scalar_prefetch = 0 : i64, scratch_operands = 0 : i64, tpu.core_type = #tpu.core_type<tc>, window_params = [{transform_indices = @transform_0, window_bounds = array<i64: 4, 32, 32>}, {pipeline_mode = #tpu.pipeline_mode<synchronous>, transform_indices = @transform_1, window_bounds = array<i64: 32, 32>}, {pipeline_mode = #tpu.pipeline_mode<synchronous>, transform_indices = @transform_2, window_bounds = array<i64: 1, 32>}, {transform_indices = @transform_3, window_bounds = array<i64: 4, 32, 32>}, {transform_indices = @transform_4, window_bounds = array<i64: 4, 32, 32>}]} {
    %c0 = arith.constant 0 : index
    %c0_0 = arith.constant 0 : index
    %c0_1 = arith.constant 0 : index
    %0 = vector.load %arg1[%c0, %c0_0, %c0_1] : memref<4x32x32xf32, #tpu.memory_space<vmem>>, vector<4x32x32xf32>
    %1 = vector.shape_cast %0 : vector<4x32x32xf32> to vector<128x32xf32>
    %c0_2 = arith.constant 0 : index
    %c0_3 = arith.constant 0 : index
    %2 = vector.load %arg2[%c0_2, %c0_3] : memref<32x32xf32, #tpu.memory_space<vmem>>, vector<32x32xf32>
    %cst = arith.constant dense<0.000000e+00> : vector<128x32xf32>
    %3 = tpu.matmul %1, %2, %cst {dimension_numbers = #tpu.dot_dimension_numbers<[1], [0], [0], [1], [0, 0, 1, 1], [], []>} : vector<128x32xf32>, vector<32x32xf32>, vector<128x32xf32> -> vector<128x32xf32>
    %c0_4 = arith.constant 0 : index
    %c0_5 = arith.constant 0 : index
    %4 = vector.load %arg3[%c0_4, %c0_5] : memref<1x32xf32, #tpu.memory_space<vmem>>, vector<1x32xf32>
    %5 = vector.broadcast %4 : vector<1x32xf32> to vector<128x32xf32>
    %6 = arith.addf %3, %5 : vector<128x32xf32>
    %cst_6 = arith.constant 0.000000e+00 : f32
    %7 = vector.broadcast %cst_6 : f32 to vector<128x32xf32>
    %8 = arith.maximumf %6, %7 : vector<128x32xf32>
    %9 = vector.extract_strided_slice %8 {offsets = [0, 0], sizes = [32, 32], strides = [1, 1]} : vector<128x32xf32> to vector<32x32xf32>
    %10 = tpu.transpose %9, [1, 0] : vector<32x32xf32> -> vector<32x32xf32>
    %11 = arith.addf %9, %10 : vector<32x32xf32>
    %cst_7 = arith.constant 5.000000e-01 : f32
    %12 = vector.broadcast %cst_7 : f32 to vector<32x32xf32>
    %13 = arith.mulf %11, %12 : vector<32x32xf32>
    %cst_8 = arith.constant 5.000000e-01 : f32
    %14 = vector.broadcast %cst_8 : f32 to vector<32x32xf32>
    %15 = arith.cmpf ogt, %13, %14 : vector<32x32xf32>
    %c0_9 = arith.constant 0 : index
    %c0_10 = arith.constant 0 : index
    %c0_11 = arith.constant 0 : index
    %16 = vector.load %arg4[%c0_9, %c0_10, %c0_11] : memref<4x32x32xf32, #tpu.memory_space<vmem>>, vector<1x32x32xf32>
    %17 = vector.shape_cast %16 : vector<1x32x32xf32> to vector<32x32xf32>
    %cst_12 = arith.constant 0.000000e+00 : f32
    %18 = vector.broadcast %cst_12 : f32 to vector<32x32xf32>
    %19 = arith.select %15, %17, %18 : vector<32x32xi1>, vector<32x32xf32>
    %c0_13 = arith.constant 0 : index
    %c0_14 = arith.constant 0 : index
    %c0_15 = arith.constant 0 : index
    %20 = vector.load %arg5[%c0_13, %c0_14, %c0_15] : memref<4x32x32xf32, #tpu.memory_space<vmem>>, vector<1x32x32xf32>
    %21 = vector.shape_cast %20 : vector<1x32x32xf32> to vector<32x32xf32>
    %22 = vector.shape_cast %19 : vector<32x32xf32> to vector<1x32x32xf32>
    tpu.vector_store %arg5[%c0_13, %c0_14, %c0_15], %22 {strides = array<i32>} : memref<4x32x32xf32, #tpu.memory_space<vmem>>, vector<1x32x32xf32>,
    %23 = vector.extract_strided_slice %8 {offsets = [32, 0], sizes = [32, 32], strides = [1, 1]} : vector<128x32xf32> to vector<32x32xf32>
    %24 = tpu.transpose %23, [1, 0] : vector<32x32xf32> -> vector<32x32xf32>
    %25 = arith.addf %23, %24 : vector<32x32xf32>
    %cst_16 = arith.constant 5.000000e-01 : f32
    %26 = vector.broadcast %cst_16 : f32 to vector<32x32xf32>
    %27 = arith.mulf %25, %26 : vector<32x32xf32>
    %cst_17 = arith.constant 5.000000e-01 : f32
    %28 = vector.broadcast %cst_17 : f32 to vector<32x32xf32>
    %29 = arith.cmpf ogt, %27, %28 : vector<32x32xf32>
    %c1 = arith.constant 1 : index
    %c0_18 = arith.constant 0 : index
    %c0_19 = arith.constant 0 : index
    %30 = vector.load %arg4[%c1, %c0_18, %c0_19] : memref<4x32x32xf32, #tpu.memory_space<vmem>>, vector<1x32x32xf32>
    %31 = vector.shape_cast %30 : vector<1x32x32xf32> to vector<32x32xf32>
    %cst_20 = arith.constant 0.000000e+00 : f32
    %32 = vector.broadcast %cst_20 : f32 to vector<32x32xf32>
    %33 = arith.select %29, %31, %32 : vector<32x32xi1>, vector<32x32xf32>
    %c1_21 = arith.constant 1 : index
    %c0_22 = arith.constant 0 : index
    %c0_23 = arith.constant 0 : index
    %34 = vector.load %arg5[%c1_21, %c0_22, %c0_23] : memref<4x32x32xf32, #tpu.memory_space<vmem>>, vector<1x32x32xf32>
    %35 = vector.shape_cast %34 : vector<1x32x32xf32> to vector<32x32xf32>
    %36 = vector.shape_cast %33 : vector<32x32xf32> to vector<1x32x32xf32>
    tpu.vector_store %arg5[%c1_21, %c0_22, %c0_23], %36 {strides = array<i32>} : memref<4x32x32xf32, #tpu.memory_space<vmem>>, vector<1x32x32xf32>,
    %37 = vector.extract_strided_slice %8 {offsets = [64, 0], sizes = [32, 32], strides = [1, 1]} : vector<128x32xf32> to vector<32x32xf32>
    %38 = tpu.transpose %37, [1, 0] : vector<32x32xf32> -> vector<32x32xf32>
    %39 = arith.addf %37, %38 : vector<32x32xf32>
    %cst_24 = arith.constant 5.000000e-01 : f32
    %40 = vector.broadcast %cst_24 : f32 to vector<32x32xf32>
    %41 = arith.mulf %39, %40 : vector<32x32xf32>
    %cst_25 = arith.constant 5.000000e-01 : f32
    %42 = vector.broadcast %cst_25 : f32 to vector<32x32xf32>
    %43 = arith.cmpf ogt, %41, %42 : vector<32x32xf32>
    %c2 = arith.constant 2 : index
    %c0_26 = arith.constant 0 : index
    %c0_27 = arith.constant 0 : index
    %44 = vector.load %arg4[%c2, %c0_26, %c0_27] : memref<4x32x32xf32, #tpu.memory_space<vmem>>, vector<1x32x32xf32>
    %45 = vector.shape_cast %44 : vector<1x32x32xf32> to vector<32x32xf32>
    %cst_28 = arith.constant 0.000000e+00 : f32
    %46 = vector.broadcast %cst_28 : f32 to vector<32x32xf32>
    %47 = arith.select %43, %45, %46 : vector<32x32xi1>, vector<32x32xf32>
    %c2_29 = arith.constant 2 : index
    %c0_30 = arith.constant 0 : index
    %c0_31 = arith.constant 0 : index
    %48 = vector.load %arg5[%c2_29, %c0_30, %c0_31] : memref<4x32x32xf32, #tpu.memory_space<vmem>>, vector<1x32x32xf32>
    %49 = vector.shape_cast %48 : vector<1x32x32xf32> to vector<32x32xf32>
    %50 = vector.shape_cast %47 : vector<32x32xf32> to vector<1x32x32xf32>
    tpu.vector_store %arg5[%c2_29, %c0_30, %c0_31], %50 {strides = array<i32>} : memref<4x32x32xf32, #tpu.memory_space<vmem>>, vector<1x32x32xf32>,
    %51 = vector.extract_strided_slice %8 {offsets = [96, 0], sizes = [32, 32], strides = [1, 1]} : vector<128x32xf32> to vector<32x32xf32>
    %52 = tpu.transpose %51, [1, 0] : vector<32x32xf32> -> vector<32x32xf32>
    %53 = arith.addf %51, %52 : vector<32x32xf32>
    %cst_32 = arith.constant 5.000000e-01 : f32
    %54 = vector.broadcast %cst_32 : f32 to vector<32x32xf32>
    %55 = arith.mulf %53, %54 : vector<32x32xf32>
    %cst_33 = arith.constant 5.000000e-01 : f32
    %56 = vector.broadcast %cst_33 : f32 to vector<32x32xf32>
    %57 = arith.cmpf ogt, %55, %56 : vector<32x32xf32>
    %c3 = arith.constant 3 : index
    %c0_34 = arith.constant 0 : index
    %c0_35 = arith.constant 0 : index
    %58 = vector.load %arg4[%c3, %c0_34, %c0_35] : memref<4x32x32xf32, #tpu.memory_space<vmem>>, vector<1x32x32xf32>
    %59 = vector.shape_cast %58 : vector<1x32x32xf32> to vector<32x32xf32>
    %cst_36 = arith.constant 0.000000e+00 : f32
    %60 = vector.broadcast %cst_36 : f32 to vector<32x32xf32>
    %61 = arith.select %57, %59, %60 : vector<32x32xi1>, vector<32x32xf32>
    %c3_37 = arith.constant 3 : index
    %c0_38 = arith.constant 0 : index
    %c0_39 = arith.constant 0 : index
    %62 = vector.load %arg5[%c3_37, %c0_38, %c0_39] : memref<4x32x32xf32, #tpu.memory_space<vmem>>, vector<1x32x32xf32>
    %63 = vector.shape_cast %62 : vector<1x32x32xf32> to vector<32x32xf32>
    %64 = vector.shape_cast %61 : vector<32x32xf32> to vector<1x32x32xf32>
    tpu.vector_store %arg5[%c3_37, %c0_38, %c0_39], %64 {strides = array<i32>} : memref<4x32x32xf32, #tpu.memory_space<vmem>>, vector<1x32x32xf32>,
    return
  }
  func.func @transform_0(%arg0: i32) -> (i32, i32, i32) {
    %c0_i32 = arith.constant 0 : i32
    %c0_i32_0 = arith.constant 0 : i32
    %c0_i32_1 = arith.constant 0 : i32
    return %arg0, %c0_i32, %c0_i32_0 : i32, i32, i32
  }
  func.func @transform_1(%arg0: i32) -> (i32, i32) {
    %c0_i32 = arith.constant 0 : i32
    %c0_i32_0 = arith.constant 0 : i32
    %c0_i32_1 = arith.constant 0 : i32
    return %c0_i32, %c0_i32_0 : i32, i32
  }
  func.func @transform_2(%arg0: i32) -> (i32, i32) {
    %c0_i32 = arith.constant 0 : i32
    %c0_i32_0 = arith.constant 0 : i32
    %c0_i32_1 = arith.constant 0 : i32
    return %c0_i32, %c0_i32_0 : i32, i32
  }
  func.func @transform_3(%arg0: i32) -> (i32, i32, i32) {
    %c0_i32 = arith.constant 0 : i32
    %c0_i32_0 = arith.constant 0 : i32
    %c0_i32_1 = arith.constant 0 : i32
    return %arg0, %c0_i32, %c0_i32_0 : i32, i32, i32
  }
  func.func @transform_4(%arg0: i32) -> (i32, i32, i32) {
    %c0_i32 = arith.constant 0 : i32
    %c0_i32_0 = arith.constant 0 : i32
    %c0_i32_1 = arith.constant 0 : i32
    return %arg0, %c0_i32, %c0_i32_0 : i32, i32, i32
  }
}

</mosaic_0001>

<bundles_post_ra>
// kernel: tpu_custom_call.1
= control target key start
LH: loop header
LB: loop body
LE: loop exit
PB: predicated region body
PF: predicated region fallthrough
CT: control target
= control target key end

     0   :  { %9 = vsyncpa [#allocation3], 0  ;;  %s1673_s0 = inlined_call_operand.hbm [shape: f32[8,32,32], index: 0, kind: input, shape index: {}]   ;;  %s1674_s1 = inlined_call_operand.hbm [shape: f32[32,32], index: 1, kind: input, shape index: {}]   ;;  %s1675_s2 = inlined_call_operand.vmem [shape: f32[1,32], index: 2, kind: input, shape index: {}]   ;;  %s1676_s3 = inlined_call_operand.hbm [shape: f32[8,32,32], index: 3, kind: input, shape index: {}]   ;;  %s1677_s4 = inlined_call_operand.hbm [shape: f32[8,32,32], index: 4, kind: output, shape index: {}]  }
   0x1   :  { %11 = vsyncpa [#allocation3 + $0x1], 0 }
   0x2   :  { %12 = vsyncpa [#allocation6], 0 }
   0x3   :  { %13 = vsyncpa [#allocation4], 0 }
   0x4   :  { %15 = vsyncpa [#allocation4 + $0x1], 0  ;;  %s1244_s15 = smov 0   ;;  %s1246_s16 = smov 0  }
   0x5   :  { %s1248_s17 = smov 0   ;;  %s1250_s18 = smov 0  }
   0x6 LB: > { %s1265_s19 = sadd.s32 1, %s1209_s18   ;;  %s28_s20 = sadd.s32 1, %s1205_s17  ;;  %s1209_s18 = sphi %s1250_s18, %s1697_s18   ;;  %s1205_s17 = sphi %s1248_s17, %s1696_s17   ;;  %s1201_s16 = sphi %s1246_s16, %s1695_s16   ;;  %s1197_s15 = sphi %s1244_s15, %s1694_s15  }
   0x7   : > { %s25_s21 = ssub.s32 %s1209_s18, %s1265_s19  ;;  %p35_p0 = scmp.ne.s32.totalorder %s1205_s17, %s1201_s16 }
   0x8   : > { %p26_p1 = scmp.eq.s32.totalorder %s25_s21, 0  ;;  %p36_p2 = scmp.eq.s32.totalorder %s1209_s18, 0 }
   0x9   : > { %p1014_p5 = scmp.lt.s32.totalorder %s1209_s18, 2  ;;  %s175_s23 = sand.u32 1, %s1209_s18  }
   0xa   : > { %s1274_s22 = scalar_select %p26_p1, %s1205_s17, %s28_s20  }
   0xb   : > { %p37_p3 = por %p36_p2, %p35_p0  ;;  %s177_s24 = sand.u32 1, %s1205_s17  }
   0xc   : > { %s1283_s25 = sshll.u32 %s177_s24, 7  ;;  %s923_s26 = sshll.u32 %s1209_s18, 11 }
   0xd   : > { %s1291_s29 = scalar_lea.hbm %s1673_s0, %s923_s26  ;;  %s179_s30 = scalar_lea.vmem [#allocation2], %s1283_s25 }
   0xe   : > { %s187_s5 = sshll.u32 %s179_s30, 4  ;;  %p1294_p6 = pnand %p1014_p5, %p37_p3  ;;  %s1298_s5 = int_to_ptr.vmem [resolvable:$true] %s187_s5 }
   0xf   : > { %s1300_s7 = scalar_lea.sflag [#allocation3], %s175_s23  ;;  %s1055_s8 = scalar_lea.hbm %s1291_s29, 2048 }
  0x10   : > { %p1056_p7 = scmp.ne.s32.totalorder %s1291_s29, %s1055_s8  ;;  %p1057_p8 = pneg %p1294_p6 }
  0x11   : > { %s1060_s11 = scalar_lea.hbm %s1673_s0, 4096  ;;  %p1061_p11 = scmp.lt.s32.totalorder %s1291_s29, %s1673_s0 }
  0x12   : > { %p1058_p9 = pnand %p1057_p8, %p1056_p7  ;;  %p1062_p12 = scmp.lt.s32.totalorder %s1060_s11, %s1055_s8 }
  0x14   : > { %p1059_p10 = pneg %p1058_p9  ;;  %p1063_p13 = por %p1062_p12, %p1061_p11 }
  0x16   : > { %p1064_p1 = pnand %p1063_p13, %p1059_p10 }
  0x18   : > { %1067 = shalt.err (!%p1064_p1)
}
  0x19   : > { %s1068_s14 = scalar_lea.vmem %s1298_s5, 2048  ;;  %s1211_s20 = smov [#allocation2]  }
  0x1a   : > { %p1069_p2 = scmp.ne.s32.totalorder %s1298_s5, %s1068_s14  ;;  %s1073_s21 = sshll.u32 %s1211_s20, 4  ;;  %s1074_s21 = int_to_ptr.vmem [resolvable:$false] %s1073_s21 }
  0x1b   : > { %s1075_s23 = scalar_lea.vmem %s1074_s21, 4096  ;;  %p1076_p7 = scmp.lt.s32.totalorder %s1298_s5, %s1074_s21 }
  0x1c   : > { %p1071_p3 = pnand %p1069_p2, %p1057_p8  ;;  %p1077_p9 = scmp.lt.s32.totalorder %s1075_s23, %s1068_s14 }
  0x1e   : > { %p1072_p5 = pneg %p1071_p3  ;;  %p1078_p4 = por %p1077_p9, %p1076_p7 }
  0x20   : > { %p1079_p11 = pnand %p1078_p4, %p1072_p5 }
  0x22   : > { %1082 = shalt.err (!%p1079_p11)
}
  0x23   : > { %s1212_s24 = smov 128   ;;  %s1213_s27 = smov 8  }
  0x24   : > { %1005 = dma.hbm_to_vmem [thread:$0]  (!%p1294_p6), %s1291_s29, 2048, %s1298_s5, %s1300_s7, %s1212_s24, %s1212_s24, %s1213_s27  }
  0x25   : > { %s201_s28 = scalar_lea.vmem [#allocation7], %s1283_s25  ;;  %s1332_s8 = sadd.s32 4294967295, %s1209_s18  }
  0x26   : > { %s209_s30 = sshll.u32 %s201_s28, 4  ;;  %s858_s9 = sadd.s32 4294967294, %s1209_s18   ;;  %s1365_s30 = int_to_ptr.vmem [resolvable:$true] %s209_s30 }
  0x27   : > { %p41_p4 = scmp.ne.s32.totalorder %s1201_s16, %s1197_s15  ;;  %p1678_p10 = scmp.eq.s32.totalorder %s1332_s8, 0 }
  0x28   : > { %p133_p12 = scmp.eq.s32.totalorder %s1332_s8, 1  ;;  %p139_p13 = scmp.eq.s32.totalorder %s858_s9, 1 }
  0x29   : > { %p1341_p1 = por %p1678_p10, %p41_p4  ;;  %p859_p2 = scmp.ge.s32.totalorder %s1209_s18, 1 }
  0x2a   : > { %p1349_p3 = por %p133_p12, %p35_p0  ;;  %p1353_p5 = por %p139_p13, %p41_p4 }
  0x2b   : > { %s1682_s10 = scalar_select %p1341_p1, 1, 0 }
  0x2c   : > { %s1683_s25 = scalar_select %p1349_p3, 1, 0 }
  0x2d   : > { %s1684_s29 = scalar_select %p1353_p5, 1, 0 }
  0x2e   : > { %p146_p7 = scmp.lt.s32.totalorder %s1209_s18, 3  ;;  %s1363_s12 = scalar_lea.hbm %s1676_s3, %s923_s26 }
  0x2f   : > { %s1214_s14 = smov [#allocation5]   ;;  %s1083_s21 = scalar_lea.hbm %s1363_s12, 2048 }
  0x30   : > { %p1367_p0 = pnand %p859_p2, %p146_p7  ;;  %s1371_s20 = sshll.u32 %s1214_s14, 4  ;;  %s159_s20 = int_to_ptr.vmem [resolvable:$true] %s1371_s20 }
  0x31   : > { %p1084_p11 = scmp.ne.s32.totalorder %s1363_s12, %s1083_s21  ;;  %s1088_s28 = scalar_lea.hbm %s1676_s3, 4096 }
  0x32   : > { %p1089_p13 = scmp.lt.s32.totalorder %s1363_s12, %s1676_s3  ;;  %p1090_p2 = scmp.lt.s32.totalorder %s1088_s28, %s1083_s21 }
  0x33   : > { %p1086_p4 = pnand %p1084_p11, %p1057_p8 }
  0x34   : > { %p1091_p7 = por %p1090_p2, %p1089_p13 }
  0x35   : > { %p1087_p12 = pneg %p1086_p4 }
  0x37   : > { %p1092_p10 = pnand %p1091_p7, %p1087_p12 }
  0x39   : > { %1095 = shalt.err (!%p1092_p10)
}
  0x3a   : > { %s1096_s11 = scalar_lea.vmem %s1365_s30, 2048  ;;  %s1215_s14 = smov [#allocation7]  }
  0x3b   : > { %p1097_p9 = scmp.ne.s32.totalorder %s1365_s30, %s1096_s11  ;;  %s1101_s26 = sshll.u32 %s1215_s14, 4  ;;  %s1102_s26 = int_to_ptr.vmem [resolvable:$false] %s1101_s26 }
  0x3c   : > { %s1103_s23 = scalar_lea.vmem %s1102_s26, 4096  ;;  %p1104_p5 = scmp.lt.s32.totalorder %s1365_s30, %s1102_s26 }
  0x3d   : > { %p1099_p11 = pnand %p1097_p9, %p1057_p8  ;;  %p1105_p3 = scmp.lt.s32.totalorder %s1103_s23, %s1096_s11 }
  0x3f   : > { %p1100_p4 = pneg %p1099_p11  ;;  %p1106_p1 = por %p1105_p3, %p1104_p5 }
  0x41   : > { %p1107_p13 = pnand %p1106_p1, %p1100_p4 }
  0x43   : > { %1110 = shalt.err (!%p1107_p13)
}
  0x44   : > { %1008 = dma.hbm_to_vmem [thread:$0]  (!%p1294_p6), %s1363_s12, 2048, %s1365_s30, %s1300_s7, %s1212_s24, %s1212_s24, %s1213_s27  }
  0x45   : > { %p1686_p8 = scmp.eq.s32.totalorder %s1332_s8, 0  ;;  %p1687_p10 = pneg %p1367_p0 }
  0x46   : > { %s1122_s21 = scalar_lea.vmem %s159_s20, 512  ;;  %p1130_p2 = scmp.lt.s32.totalorder %s159_s20, %s159_s20 }
  0x47   : > { %p999_p9 = pnand %p1687_p10, %p1686_p8  ;;  %p1123_p1 = scmp.ne.s32.totalorder %s159_s20, %s1122_s21 }
  0x48   : > { %p1131_p7 = scmp.lt.s32.totalorder %s1122_s21, %s1122_s21 }
  0x49   : > { %p1113_p3 = pneg %p999_p9 }
  0x4a   : > { %p1132_p11 = por %p1131_p7, %p1130_p2 }
  0x4b   : > { %p1125_p5 = pnand %p1123_p1, %p1113_p3 }
  0x4d   : > { %p1126_p12 = pneg %p1125_p5 }
  0x4f   : > { %p1133_p4 = pnand %p1132_p11, %p1126_p12 }
  0x51   : > { %1136 = shalt.err (!%p1133_p4)
}
  0x52   : > { %1001 = dma.hbm_to_vmem [thread:$0]  (!%p999_p9), %s1674_s1, 512, %s159_s20, [#allocation6], %s1212_s24, %s1212_s24, %s1213_s27  }
  0x53   : > { %221 = sbr.rel (%p1367_p0) target bundleno = 484 (0x1e4), region = 36  ;;  %s223_s30 = sand.u32 (!%p1367_p0), 1, %s1332_s8  }
  0x54   : > { %s225_s12 = sand.u32 (!%p1367_p0), 1, %s1201_s16   ;;  %s224_s9 = scalar_lea.sflag (!%p1367_p0), [#allocation3], %s223_s30 }
  0x55   : > { %s1419_s28 = sshll.u32 (!%p1367_p0), %s225_s12, 7  ;;  %p1688_p6 = scmp.ne.s32.totalorder (!%p1367_p0), %s1682_s10, 0 }
  0x56   : > { %s1422_s5 = scalar_lea.vmem (!%p1367_p0), [#allocation2], %s1419_s28 }
  0x58   : > { %1180 = dma.done.wait (%p1688_p6), %s224_s9, 2048  }
  0x59   : > { %1182 = vsyncadd (%p1688_p6), %s224_s9, 4294965248  ;;  %p1689_p0 = scmp.eq.s32.totalorder %s1332_s8, 0 }
  0x5b   : > { %1184 = dma.done.wait (%p1689_p0), [#allocation6], 512   ;;  %p1690_p13 = pmov %p1689_p0 }
  0x5c   : > { %s1433_s24 = scalar_lea.vmem [#allocation7], %s1419_s28 }
  0x5d   : > { %1186 = vsyncadd (%p1690_p13), [#allocation6], 4294966784 }
  0x5e   : > { %1188 = dma.done.wait (%p1688_p6), %s224_s9, 2048  }
  0x5f   : > { %1190 = vsyncadd (%p1688_p6), %s224_s9, 4294965248  ;;  %vm300_vm0 = vcmask 261120   ;;  %v292_v0 = vld [vmem:[#allocation5 + $0x18] sm:$0xff]  ;;  %v291_v1 = vld [vmem:[#allocation5 + $0x10] sm:$0xff]  ;;  %s1548_s13 = scalar_lea.vmem [#allocation8], %s1419_s28  ;;  %s927_s20 = sshll.u32 %s1332_s8, 11 }
  0x60   : > { %948 = vmatprep.subr.mxu0 %v292_v0  ;;  %v273_v2 = vld [vmem:[%s1422_s5] sm:$0xff]  ;;  %980 = vmatprep.subr.mxu1 %v292_v0  ;;  %v290_v3 = vld [vmem:[#allocation5 + $0x8] sm:$0xff]  ;;  %v275_v6 = vld [vmem:[%s1422_s5 + $0x10] sm:$0xff]  ;;  %s755_s11 = sshll.u32 %s1548_s13, 4  ;;  %s1624_s23 = scalar_lea.hbm %s1677_s4, %s927_s20  ;;  %s1626_s11 = int_to_ptr.vmem [resolvable:$true] %s755_s11 }
  0x61   : > { %949 = vmatpush3.msra.mxu0 %v292_v0  ;;  %956 = vmatprep.mubr.msk.f32.mxu0 %vm300_vm0, %v273_v2  ;;  %v289_v4 = vld [vmem:[#allocation5] sm:$0xff]  ;;  %v274_v5 = vld [vmem:[%s1422_s5 + $0x8] sm:$0xff]  ;;  %v283_v9 = vld [vmem:[%s1422_s5 + $0x50] sm:$0xff]  ;;  %s1632_s8 = scalar_lea.sflag [#allocation4], %s225_s12  ;;  %s1137_s21 = scalar_lea.vmem %s1626_s11, 2048 }
  0x62   : > { %950 = vmatprep.subr.mxu0 %v291_v1  ;;  %984 = vmatpush3.msra.mxu1 %v292_v0  ;;  %v281_v7 = vld [vmem:[%s1422_s5 + $0x40] sm:$0xff]  ;;  %v282_v8 = vld [vmem:[%s1422_s5 + $0x48] sm:$0xff]  ;;  %v276_v10 = vld [vmem:[%s1422_s5 + $0x18] sm:$0xff]  ;;  %p1138_p8 = scmp.ne.s32.totalorder %s1626_s11, %s1137_s21  ;;  %p1691_p10 = scmp.ne.s32.totalorder %s1683_s25, 0 }
  0x63   : > { %951 = vmatpush3.msra.mxu0 %v291_v1  ;;  %981 = vmatprep.subr.mxu1 %v291_v1  ;;  %v277_v11 = vld [vmem:[%s1422_s5 + $0x20] sm:$0xff]  ;;  %v284_v12 = vld [vmem:[%s1422_s5 + $0x58] sm:$0xff]  ;;  %v278_v14 = vld [vmem:[%s1422_s5 + $0x28] sm:$0xff]  ;;  %s1216_s6 = smov [#allocation8]  }
  0x64   : > { %952 = vmatprep.subr.mxu0 %v290_v3  ;;  %985 = vmatpush3.msra.mxu1 %v291_v1  ;;  %v285_v13 = vld [vmem:[%s1422_s5 + $0x60] sm:$0xff]  ;;  %v279_v15 = vld [vmem:[%s1422_s5 + $0x30] sm:$0xff]  ;;  %v286_v16 = vld [vmem:[%s1422_s5 + $0x68] sm:$0xff]  ;;  %p1139_p9 = pnand %p1138_p8, %p1691_p10  ;;  %s1141_s7 = sshll.u32 %s1216_s6, 4  ;;  %s1142_s7 = int_to_ptr.vmem [resolvable:$false] %s1141_s7 }
  0x65   : > { %953 = vmatpush3.msra.mxu0 %v290_v3  ;;  %982 = vmatprep.subr.mxu1 %v290_v3  ;;  %v287_v17 = vld [vmem:[%s1422_s5 + $0x70] sm:$0xff]  ;;  %v280_v18 = vld [vmem:[%s1422_s5 + $0x38] sm:$0xff]  ;;  %v875_v21 = vld [vmem:[%s1675_s2] ss:$0 sm:$0xff]  ;;  %s1143_s30 = scalar_lea.vmem %s1142_s7, 4096  ;;  %p1144_p1 = scmp.lt.s32.totalorder %s1626_s11, %s1142_s7 }
  0x66   : > { %954 = vmatprep.subr.mxu0 %v289_v4  ;;  %986 = vmatpush3.msra.mxu1 %v290_v3  ;;  %v288_v19 = vld [vmem:[%s1422_s5 + $0x78] sm:$0xff]  ;;  %p1140_p3 = pneg %p1139_p9  ;;  %p1145_p5 = scmp.lt.s32.totalorder %s1143_s30, %s1137_s21 }
  0x67   : > { %955 = vmatpush3.msra.mxu0 %v289_v4  ;;  %983 = vmatprep.subr.mxu1 %v289_v4 }
  0x68   : > { %957 = vmatmul.mubr.msk.f32.vlgmr.msra.gmra.mxu0 %vm300_vm0, %v274_v5  ;;  %987 = vmatpush3.msra.mxu1 %v289_v4  ;;  %p1146_p12 = por %p1145_p5, %p1144_p1 }
  0x69   : > { %959 = vmatprep.mubr.msk.f32.mxu0 %vm300_vm0, %v275_v6  ;;  %968 = vmatprep.mubr.msk.f32.mxu1 %vm300_vm0, %v281_v7  ;;  %v554_v7 = vld [vmem:[%s1433_s24] sm:$0xff] }
  0x6a   : > { %969 = vmatmul.mubr.msk.f32.vlgmr.msra.gmra.mxu1 %vm300_vm0, %v282_v8  ;;  %p1147_p2 = pnand %p1146_p12, %p1140_p3 }
  0x6b   : > { %971 = vmatprep.mubr.msk.f32.mxu1 %vm300_vm0, %v283_v9 }
  0x6c   : > { %960 = vmatmul.mubr.msk.f32.gmra.mxu0 %vm300_vm0, %v276_v10 }
  0x6d   : > { %962 = vmatprep.mubr.msk.f32.mxu0 %vm300_vm0, %v277_v11 }
  0x6e   : > { %972 = vmatmul.mubr.msk.f32.gmra.mxu1 %vm300_vm0, %v284_v12  ;;  %v555_v12 = vld [vmem:[%s1433_s24 + $0x8] sm:$0xff] }
  0x6f   : > { %974 = vmatprep.mubr.msk.f32.mxu1 %vm300_vm0, %v285_v13 }
  0x70   : > { %963 = vmatmul.mubr.msk.f32.gmra.mxu0 %vm300_vm0, %v278_v14 }
  0x71   : > { %965 = vmatprep.mubr.msk.f32.mxu0 %vm300_vm0, %v279_v15 }
  0x72   : > { %975 = vmatmul.mubr.msk.f32.gmra.mxu1 %vm300_vm0, %v286_v16 }
  0x73   : > { %977 = vmatprep.mubr.msk.f32.mxu1 %vm300_vm0, %v287_v17 }
  0x74   : > { %966 = vmatmul.mubr.msk.f32.gmra.mxu0 %vm300_vm0, %v280_v18 }
  0x76   : > { %978 = vmatmul.mubr.msk.f32.gmra.mxu1 %vm300_vm0, %v288_v19  ;;  %v892_v19 = vld [vmem:[%s1433_s24 + $0x20] sm:$0xff] }
 0x128   : > { %v958_v20 = vpop.f32.mrf.mxu0 }
 0x129   : > { %v1476_v26 = vadd.f32 %v958_v20, %v875_v21 }
 0x12a   : > { %v415_v22 = vpop.f32.mrf.mxu0  ;;  %v970_v23 = vpop.f32.mrf.mxu1 }
 0x12b   : > { %v1474_v24 = vadd.f32 %v875_v21, %v415_v22  ;;  %v495_v31 = vmax.f32 %v1476_v26, 0.0  ;;  %v1502_v49 = vadd.f32 %v970_v23, %v875_v21 }
 0x12c   : > { %v961_v25 = vpop.f32.mrf.mxu0  ;;  %v455_v29 = vpop.f32.mrf.mxu1 }
 0x12d   : > { %v494_v27 = vmax.f32 %v1474_v24, 0.0  ;;  %v1484_v37 = vadd.f32 %v961_v25, %v875_v21  ;;  %v1494_v46 = vadd.f32 %v875_v21, %v455_v29  ;;  %v503_v54 = vmax.f32 %v1502_v49, 0.0  ;;  %v893_v29 = vld [vmem:[%s1433_s24 + $0x28] sm:$0xff] }
 0x12e   : > { %v425_v28 = vpop.f32.mrf.mxu0  ;;  %v973_v34 = vpop.f32.mrf.mxu1 }
 0x12f   : > { %510 = vxpose.xlu0.b32.start [1/4] (short) (narrow) %v494_v27, 32  ;;  %v1480_v32 = vadd.f32 %v875_v21, %v425_v28  ;;  %v497_v43 = vmax.f32 %v1484_v37, 0.0  ;;  %v502_v51 = vmax.f32 %v1494_v46, 0.0  ;;  %v1520_v58 = vadd.f32 %v973_v34, %v875_v21 }
 0x130   : > { %v964_v30 = vpop.f32.mrf.mxu0  ;;  %v465_v42 = vpop.f32.mrf.mxu1 }
 0x131   : > { %v496_v38 = vmax.f32 %v1480_v32, 0.0  ;;  %v1487_v39 = vadd.f32 %v964_v30, %v875_v21  ;;  %v1512_v55 = vadd.f32 %v875_v21, %v465_v42  ;;  %v505_v63 = vmax.f32 %v1520_v58, 0.0 }
 0x132   : > { %v435_v33 = vpop.f32.mrf.mxu0  ;;  %v976_v47 = vpop.f32.mrf.mxu1 }
 0x133   : > { %v1482_v35 = vadd.f32 %v875_v21, %v435_v33  ;;  %511 = vxpose.xlu0.b32.cont [2/4] (short) (narrow) %v495_v31, 32  ;;  %v499_v44 = vmax.f32 %v1487_v39, 0.0  ;;  %v504_v59 = vmax.f32 %v1512_v55, 0.0  ;;  %v1523_v60 = vadd.f32 %v976_v47, %v875_v21  ;;  %v894_v39 = vld [vmem:[%s1433_s24 + $0x30] sm:$0xff] }
 0x134   : > { %v967_v36 = vpop.f32.mrf.mxu0  ;;  %v475_v52 = vpop.f32.mrf.mxu1 }
 0x135   : > { %v498_v40 = vmax.f32 %v1482_v35, 0.0  ;;  %v1500_v48 = vadd.f32 %v967_v36, %v875_v21  ;;  %v1514_v56 = vadd.f32 %v875_v21, %v475_v52  ;;  %v507_v0 = vmax.f32 %v1523_v60, 0.0 }
 0x136   : > { %v445_v41 = vpop.f32.mrf.mxu0  ;;  %v979_v57 = vpop.f32.mrf.mxu1 }
 0x137   : > { %566 = vxpose.xlu1.b32.start [1/4] (short) (narrow) %v498_v40, 32  ;;  %512 = vxpose.xlu0.b32.cont [3/4] (short) (narrow) %v496_v38, 32  ;;  %v1492_v45 = vadd.f32 %v875_v21, %v445_v41  ;;  %v501_v53 = vmax.f32 %v1500_v48, 0.0  ;;  %v506_v61 = vmax.f32 %v1514_v56, 0.0  ;;  %v1538_v2 = vadd.f32 %v979_v57, %v875_v21  ;;  %v900_v41 = vld [vmem:[%s1433_s24 + $0x40] sm:$0xff]  ;;  %v901_v57 = vld [vmem:[%s1433_s24 + $0x48] sm:$0xff] }
 0x138   : > { %v485_v62 = vpop.f32.mrf.mxu1 }
 0x139   : > { %v500_v50 = vmax.f32 %v1492_v45, 0.0  ;;  %v1532_v1 = vadd.f32 %v875_v21, %v485_v62  ;;  %v509_v4 = vmax.f32 %v1538_v2, 0.0  ;;  %v556_v21 = vld [vmem:[%s1433_s24 + $0x10] sm:$0xff] }
 0x13b   : > { %567 = vxpose.xlu1.b32.cont [2/4] (short) (narrow) %v499_v44, 32  ;;  %513 = vxpose.xlu0.b32.end [4/4] (short) (narrow) %v497_v43, 32  ;;  %v508_v3 = vmax.f32 %v1532_v1, 0.0 }
 0x13f   : > { %568 = vxpose.xlu1.b32.cont [3/4] (short) (narrow) %v500_v50, 32  ;;  %624 = vxpose.xlu0.b32.start [1/4] (short) (narrow) %v502_v51, 32 }
 0x143   : > { %569 = vxpose.xlu1.b32.end [4/4] (short) (narrow) %v501_v53, 32  ;;  %625 = vxpose.xlu0.b32.cont [2/4] (short) (narrow) %v503_v54, 32 }
 0x147   : > { %682 = vxpose.xlu1.b32.start [1/4] (short) (narrow) %v506_v61, 32  ;;  %626 = vxpose.xlu0.b32.cont [3/4] (short) (narrow) %v504_v59, 32 }
 0x14b   : > { %683 = vxpose.xlu1.b32.cont [2/4] (short) (narrow) %v507_v0, 32  ;;  %627 = vxpose.xlu0.b32.end [4/4] (short) (narrow) %v505_v63, 32 }
 0x14f   : > { %684 = vxpose.xlu1.b32.cont [3/4] (short) (narrow) %v508_v3, 32 }
 0x153   : > { %685 = vxpose.xlu1.b32.end [4/4] (short) (narrow) %v509_v4, 32 }
 0x1ab   : > { %v526_v5 = vpop.trf.xlu0 }
 0x1ac   : > { %v542_v6 = vadd.f32 %v526_v5, %v494_v27 }
 0x1ae   : > { %v546_v8 = vmul.f32 0.5, %v542_v6 }
 0x1af   : > { %v527_v9 = vpop.trf.xlu0 }
 0x1b0   : > { %vm550_vm1 = vcmp.gt.f32.partialorder %v546_v8, 0.5  ;;  %v543_v10 = vadd.f32 %v527_v9, %v495_v31  ;;  %v557_v31 = vld [vmem:[%s1433_s24 + $0x18] sm:$0xff]  ;;  %v902_v9 = vld [vmem:[%s1433_s24 + $0x50] sm:$0xff] }
 0x1b1   : > { %v558_v11 = vsel %vm550_vm1, %v554_v7, 0.0  ;;  %v908_v7 = vld [vmem:[%s1433_s24 + $0x60] sm:$0xff] }
 0x1b2   : > { %562 = vst.msk [vmem:[%s1548_s13] sm:$0xff] %vm300_vm0, %v558_v11  ;;  %v547_v13 = vmul.f32 0.5, %v543_v10 }
 0x1b3   : > { %v582_v14 = vpop.trf.xlu1  ;;  %v528_v15 = vpop.trf.xlu0 }
 0x1b4   : > { %vm551_vm2 = vcmp.gt.f32.partialorder %v547_v13, 0.5  ;;  %v598_v16 = vadd.f32 %v582_v14, %v498_v40  ;;  %v544_v17 = vadd.f32 %v528_v15, %v496_v38  ;;  %v909_v13 = vld [vmem:[%s1433_s24 + $0x68] sm:$0xff]  ;;  %v903_v15 = vld [vmem:[%s1433_s24 + $0x58] sm:$0xff] }
 0x1b5   : > { %v559_v18 = vsel %vm551_vm2, %v555_v12, 0.0 }
 0x1b6   : > { %563 = vst.msk [vmem:[%s1548_s13 + $0x8] sm:$0xff] %vm300_vm0, %v559_v18  ;;  %v602_v20 = vmul.f32 0.5, %v598_v16  ;;  %v548_v22 = vmul.f32 0.5, %v544_v17  ;;  %v910_v17 = vld [vmem:[%s1433_s24 + $0x70] sm:$0xff] }
 0x1b7   : > { %v583_v23 = vpop.trf.xlu1  ;;  %v529_v24 = vpop.trf.xlu0 }
 0x1b8   : > { %vm606_vm3 = vcmp.gt.f32.partialorder %v602_v20, 0.5  ;;  %vm552_vm4 = vcmp.gt.f32.partialorder %v548_v22, 0.5  ;;  %v599_v25 = vadd.f32 %v583_v23, %v499_v44  ;;  %v545_v26 = vadd.f32 %v529_v24, %v497_v43 }
 0x1b9   : > { %v615_v27 = vsel %vm606_vm3, %v892_v19, 0.0  ;;  %v560_v28 = vsel %vm552_vm4, %v556_v21, 0.0 }
 0x1ba   : > { %896 = vst.msk [vmem:[%s1548_s13 + $0x20] sm:$0xff] %vm300_vm0, %v615_v27  ;;  %564 = vst.msk [vmem:[%s1548_s13 + $0x10] sm:$0xff] %vm300_vm0, %v560_v28  ;;  %v603_v30 = vmul.f32 0.5, %v599_v25  ;;  %v549_v32 = vmul.f32 0.5, %v545_v26 }
 0x1bb   : > { %v584_v33 = vpop.trf.xlu1  ;;  %v640_v34 = vpop.trf.xlu0 }
 0x1bc   : > { %vm607_vm5 = vcmp.gt.f32.partialorder %v603_v30, 0.5  ;;  %vm553_vm6 = vcmp.gt.f32.partialorder %v549_v32, 0.5  ;;  %v600_v35 = vadd.f32 %v584_v33, %v500_v50  ;;  %v656_v36 = vadd.f32 %v640_v34, %v502_v51  ;;  %v895_v51 = vld [vmem:[%s1433_s24 + $0x38] sm:$0xff] }
 0x1bd   : > { %v616_v37 = vsel %vm607_vm5, %v893_v29, 0.0  ;;  %v561_v38 = vsel %vm553_vm6, %v557_v31, 0.0 }
 0x1be   : > { %897 = vst.msk [vmem:[%s1548_s13 + $0x28] sm:$0xff] %vm300_vm0, %v616_v37  ;;  %565 = vst.msk [vmem:[%s1548_s13 + $0x18] sm:$0xff] %vm300_vm0, %v561_v38  ;;  %v604_v40 = vmul.f32 0.5, %v600_v35  ;;  %v660_v42 = vmul.f32 0.5, %v656_v36 }
 0x1bf   : > { %v585_v43 = vpop.trf.xlu1  ;;  %v641_v44 = vpop.trf.xlu0 }
 0x1c0   : > { %vm608_vm7 = vcmp.gt.f32.partialorder %v604_v40, 0.5  ;;  %vm664_vm8 = vcmp.gt.f32.partialorder %v660_v42, 0.5  ;;  %v601_v45 = vadd.f32 %v585_v43, %v501_v53  ;;  %v657_v46 = vadd.f32 %v641_v44, %v503_v54 }
 0x1c1   : > { %v617_v47 = vsel %vm608_vm7, %v894_v39, 0.0  ;;  %v673_v50 = vsel %vm664_vm8, %v900_v41, 0.0 }
 0x1c2   : > { %898 = vst.msk [vmem:[%s1548_s13 + $0x30] sm:$0xff] %vm300_vm0, %v617_v47  ;;  %904 = vst.msk [vmem:[%s1548_s13 + $0x40] sm:$0xff] %vm300_vm0, %v673_v50  ;;  %v605_v52 = vmul.f32 0.5, %v601_v45  ;;  %v661_v62 = vmul.f32 0.5, %v657_v46 }
 0x1c3   : > { %v698_v5 = vpop.trf.xlu1  ;;  %v642_v48 = vpop.trf.xlu0 }
 0x1c4   : > { %vm609_vm9 = vcmp.gt.f32.partialorder %v605_v52, 0.5  ;;  %vm665_vm10 = vcmp.gt.f32.partialorder %v661_v62, 0.5  ;;  %v714_v49 = vadd.f32 %v698_v5, %v506_v61  ;;  %v658_v53 = vadd.f32 %v642_v48, %v504_v59 }
 0x1c5   : > { %v618_v54 = vsel %vm609_vm9, %v895_v51, 0.0  ;;  %v674_v6 = vsel %vm665_vm10, %v901_v57, 0.0 }
 0x1c6   : > { %899 = vst.msk [vmem:[%s1548_s13 + $0x38] sm:$0xff] %vm300_vm0, %v618_v54  ;;  %905 = vst.msk [vmem:[%s1548_s13 + $0x48] sm:$0xff] %vm300_vm0, %v674_v6  ;;  %v718_v8 = vmul.f32 0.5, %v714_v49  ;;  %v662_v10 = vmul.f32 0.5, %v658_v53 }
 0x1c7   : > { %v699_v11 = vpop.trf.xlu1  ;;  %v643_v56 = vpop.trf.xlu0 }
 0x1c8   : > { %vm722_vm11 = vcmp.gt.f32.partialorder %v718_v8, 0.5  ;;  %vm666_vm12 = vcmp.gt.f32.partialorder %v662_v10, 0.5  ;;  %v715_v55 = vadd.f32 %v699_v11, %v507_v0  ;;  %v659_v59 = vadd.f32 %v643_v56, %v505_v63 }
 0x1c9   : > { %v731_v61 = vsel %vm722_vm11, %v908_v7, 0.0  ;;  %v675_v12 = vsel %vm666_vm12, %v902_v9, 0.0 }
 0x1ca   : > { %912 = vst.msk [vmem:[%s1548_s13 + $0x60] sm:$0xff] %vm300_vm0, %v731_v61  ;;  %906 = vst.msk [vmem:[%s1548_s13 + $0x50] sm:$0xff] %vm300_vm0, %v675_v12  ;;  %v719_v14 = vmul.f32 0.5, %v715_v55  ;;  %v663_v16 = vmul.f32 0.5, %v659_v59 }
 0x1cb   : > { %v700_v60 = vpop.trf.xlu1 }
 0x1cc   : > { %vm723_vm13 = vcmp.gt.f32.partialorder %v719_v14, 0.5  ;;  %vm667_vm14 = vcmp.gt.f32.partialorder %v663_v16, 0.5  ;;  %v716_v58 = vadd.f32 %v700_v60, %v508_v3  ;;  %v911_v3 = vld [vmem:[%s1433_s24 + $0x78] sm:$0xff] }
 0x1cd   : > { %v732_v63 = vsel %vm723_vm13, %v909_v13, 0.0  ;;  %v676_v0 = vsel %vm667_vm14, %v903_v15, 0.0 }
 0x1ce   : > { %913 = vst.msk [vmem:[%s1548_s13 + $0x68] sm:$0xff] %vm300_vm0, %v732_v63  ;;  %907 = vst.msk [vmem:[%s1548_s13 + $0x58] sm:$0xff] %vm300_vm0, %v676_v0  ;;  %v720_v18 = vmul.f32 0.5, %v716_v58 }
 0x1cf   : > { %v701_v19 = vpop.trf.xlu1 }
 0x1d0   : > { %vm724_vm15 = vcmp.gt.f32.partialorder %v720_v18, 0.5  ;;  %v717_v20 = vadd.f32 %v701_v19, %v509_v4 }
 0x1d1   : > { %v733_v1 = vsel %vm724_vm15, %v910_v17, 0.0 }
 0x1d2   : > { %914 = vst.msk [vmem:[%s1548_s13 + $0x70] sm:$0xff] %vm300_vm0, %v733_v1  ;;  %v721_v21 = vmul.f32 0.5, %v717_v20 }
 0x1d4   : > { %vm725_vm1 = vcmp.gt.f32.partialorder %v721_v21, 0.5 }
 0x1d5   : > { %v734_v2 = vsel %vm725_vm1, %v911_v3, 0.0 }
 0x1d6   : > { %915 = vst.msk [vmem:[%s1548_s13 + $0x78] sm:$0xff] %vm300_vm0, %v734_v2 }
 0x1d7   : > { %1150 = shalt.err (!%p1147_p2)
}
 0x1d8   : > { %s1151_s12 = scalar_lea.hbm %s1624_s23, 2048  ;;  %s1155_s5 = scalar_lea.hbm %s1677_s4, 4096 }
 0x1d9   : > { %p1152_p7 = scmp.ne.s32.totalorder %s1624_s23, %s1151_s12  ;;  %p1156_p6 = scmp.lt.s32.totalorder %s1624_s23, %s1677_s4 }
 0x1da   : > { %p1157_p0 = scmp.lt.s32.totalorder %s1155_s5, %s1151_s12 }
 0x1db   : > { %p1153_p11 = pnand %p1152_p7, %p1691_p10 }
 0x1dc   : > { %p1158_p13 = por %p1157_p0, %p1156_p6 }
 0x1dd   : > { %p1154_p4 = pneg %p1153_p11 }
 0x1df   : > { %p1159_p8 = pnand %p1158_p13, %p1154_p4 }
 0x1e1   : > { %1162 = shalt.err (!%p1159_p8)
}
 0x1e2   : > { %s1217_s10 = smov 128   ;;  %s1218_s13 = smov 8  }
 0x1e3   : > { %996 = dma.vmem_to_hbm [thread:$0]  (%p1691_p10), %s1626_s11, 2048, %s1624_s23, %s1632_s8, %s1217_s10, %s1217_s10, %s1218_s13  }
 0x1e4 PF: > { %s770_s20 = sand.u32 1, %s1197_s15   ;;  %p1692_p9 = scmp.ne.s32.totalorder %s1684_s29, 0 }
 0x1e5   : > { %p1693_p3 = scmp.ge.s32.totalorder %s1209_s18, 2  ;;  %s771_s14 = scalar_lea.sflag [#allocation4], %s770_s20 }
 0x1e7   : > { %p1010_p1 = pnand %p1693_p3, %p1692_p9 }
 0x1e9   : > { %p1011_p5 = pneg %p1010_p1 }
 0x1eb   : > { %1192 = dma.done.wait (%p1011_p5), %s771_s14, 2048  }
 0x1ec   : > { %1194 = vsyncadd (%p1011_p5), %s771_s14, 4294965248  ;;  %p18_p12 = scmp.ge.s32.totalorder %s1265_s19, 4   ;;  %s1694_s15 = smov %s1201_s16 }
 0x1ed   : > { %s1695_s16 = smov %s1205_s17  ;;  %s1696_s17 = smov %s1274_s22 }
 0x1ee   : > { %s1697_s18 = smov %s1265_s19  ;;  %20 = sbr.rel (!%p18_p12) target bundleno = 6 (0x6), region = 102 }
 0x1f3   :  { %776 = vsyncpa [#allocation3], 1 }
 0x1f4   :  { %778 = vsyncpa [#allocation3 + $0x1], 1 }
 0x1f5   :  { %779 = vsyncpa [#allocation6], 1 }
 0x1f6   :  { %780 = vsyncpa [#allocation4], 1 }
 0x1f7   :  { %782 = vsyncpa [#allocation4 + $0x1], 1 }

</bundles_post_ra>
